<compile_context>
chip_gen: v7x
topology: tpu7x:2x2x1
jax: 0.10.0
libtpu: 0.0.40
codegen_flags: <defaults>
</compile_context>

<pallas_src>
import jax
import jax.numpy as jnp
from jax.experimental import pallas as pl
from jax.experimental.pallas import tpu as pltpu


def regress_kernel(x_ref, w_ref, b_ref, o_ref):
    # x_ref: (TB, dim_in) f32     w_ref: (dim_in, dim_out) bf16 (VMEM-resident)
    # b_ref: (1, dim_out) f32     o_ref: (TB, dim_out) f32
    x = x_ref[...]
    w = w_ref[...].astype(jnp.float32)        # bf16 in HBM/VMEM, upcast for the matmul
    y = jnp.dot(x, w, preferred_element_type=jnp.float32) + b_ref[...]
    o_ref[...] = jnp.maximum(y, 0.0).astype(o_ref.dtype)     # ReLU


def regress(x, w_io, b2d):
    """Forward pass of Regress: relu(x.view(B, -1) @ W + b).

    x:    (B, ...) -- flattened to (B, dim_in).
    w_io: (dim_in, dim_out) weight, ALREADY stored in (in, out) layout (bf16).
    b2d:  (1, dim_out) f32 bias.
    Returns (B, dim_out) f32.
    """
    B = x.shape[0]
    x2d = x.reshape(B, -1).astype(jnp.float32)
    dim_in, dim_out = w_io.shape

    # Batch tile: multiple of 8 sublanes (or the full batch when B < 8).
    TB = 8 if B >= 8 else B
    Bp = pl.cdiv(B, TB) * TB
    if Bp != B:
        x2d = jnp.pad(x2d, ((0, Bp - B), (0, 0)))

    out = pl.pallas_call(
        regress_kernel,
        out_shape=jax.ShapeDtypeStruct((Bp, dim_out), jnp.float32),
        grid_spec=pltpu.PrefetchScalarGridSpec(
            num_scalar_prefetch=0,
            grid=(Bp // TB,),
            in_specs=[
                pl.BlockSpec((TB, dim_in), lambda i: (i, 0)),        # x: tiled over batch
                pl.BlockSpec((dim_in, dim_out), lambda i: (0, 0)),   # weight: resident
                pl.BlockSpec((1, dim_out), lambda i: (0, 0)),        # bias: resident
            ],
            out_specs=pl.BlockSpec((TB, dim_out), lambda i: (i, 0)),
        ),
        compiler_params=pltpu.CompilerParams(
            dimension_semantics=("parallel",)),   # shard batch tiles across TCs
    )(x2d, w_io, b2d)
    return out[:B]


if __name__ == "__main__":
    # Small shapes consistent with Regress: x = (16, 4, 16, 16) -> dim_in = 1024.
    B, C, H, W = 16, 4, 16, 16
    dim_in = C * H * W          # 1024
    dim_out = 256               # multiple of 128 -> lane-dense output stores

    key = jax.random.PRNGKey(0)
    kx, kw, kb = jax.random.split(key, 3)

    x = jax.random.normal(kx, (B, C, H, W), dtype=jnp.float32)

    # Parameters initialized ONCE in kernel-friendly layout/dtype:
    # weight in (in_features, out_features) bf16; bias as a (1, dim_out) f32 row.
    bound = 1.0 / (dim_in ** 0.5)
    w_io = jax.random.uniform(kw, (dim_in, dim_out), jnp.float32,
                              -bound, bound).astype(jnp.bfloat16)
    b2d = jax.random.uniform(kb, (1, dim_out), jnp.float32, -bound, bound)

    fwd = jax.jit(regress)
    out = jax.block_until_ready(fwd(x, w_io, b2d))

    # Pure-JAX reference with the same parameters.
    x2d = x.reshape(B, -1)
    ref = jnp.maximum(x2d @ w_io.astype(jnp.float32) + b2d, 0.0)
    assert out.shape == (B, dim_out)
    assert jnp.allclose(out, ref, atol=1e-4, rtol=1e-4), \
        float(jnp.max(jnp.abs(out - ref)))

    print("KERNEL_OK")
</pallas_src>

<mosaic_0001>
module attributes {stable_mosaic.version = 11 : i64} {
  func.func @regress_kernel(%arg0: i32, %arg1: memref<8x1024xf32, #tpu.memory_space<vmem>>, %arg2: memref<1024x256xbf16, #tpu.memory_space<vmem>>, %arg3: memref<1x256xf32, #tpu.memory_space<vmem>>, %arg4: memref<8x256xf32, #tpu.memory_space<vmem>>) attributes {dimension_semantics = [#tpu.dimension_semantics<parallel>], iteration_bounds = array<i64: 2>, scalar_prefetch = 0 : i64, scratch_operands = 0 : i64, tpu.core_type = #tpu.core_type<tc>, window_params = [{transform_indices = @transform_0, window_bounds = array<i64: 8, 1024>}, {pipeline_mode = #tpu.pipeline_mode<synchronous>, transform_indices = @transform_1, window_bounds = array<i64: 1024, 256>}, {pipeline_mode = #tpu.pipeline_mode<synchronous>, transform_indices = @transform_2, window_bounds = array<i64: 1, 256>}, {transform_indices = @transform_3, window_bounds = array<i64: 8, 256>}]} {
    %c0 = arith.constant 0 : index
    %c0_0 = arith.constant 0 : index
    %0 = vector.load %arg1[%c0, %c0_0] : memref<8x1024xf32, #tpu.memory_space<vmem>>, vector<8x1024xf32>
    %c0_1 = arith.constant 0 : index
    %c0_2 = arith.constant 0 : index
    %1 = vector.load %arg2[%c0_1, %c0_2] : memref<1024x256xbf16, #tpu.memory_space<vmem>>, vector<1024x256xbf16>
    %2 = arith.extf %1 : vector<1024x256xbf16> to vector<1024x256xf32>
    %cst = arith.constant dense<0.000000e+00> : vector<8x256xf32>
    %3 = tpu.matmul %0, %2, %cst {dimension_numbers = #tpu.dot_dimension_numbers<[1], [0], [0], [1], [0, 0, 1, 1], [], []>} : vector<8x1024xf32>, vector<1024x256xf32>, vector<8x256xf32> -> vector<8x256xf32>
    %c0_3 = arith.constant 0 : index
    %c0_4 = arith.constant 0 : index
    %4 = vector.load %arg3[%c0_3, %c0_4] : memref<1x256xf32, #tpu.memory_space<vmem>>, vector<1x256xf32>
    %5 = vector.broadcast %4 : vector<1x256xf32> to vector<8x256xf32>
    %6 = arith.addf %3, %5 : vector<8x256xf32>
    %cst_5 = arith.constant 0.000000e+00 : f32
    %7 = vector.broadcast %cst_5 : f32 to vector<8x256xf32>
    %8 = arith.maximumf %6, %7 : vector<8x256xf32>
    %c0_6 = arith.constant 0 : index
    %c0_7 = arith.constant 0 : index
    %9 = vector.load %arg4[%c0_6, %c0_7] : memref<8x256xf32, #tpu.memory_space<vmem>>, vector<8x256xf32>
    tpu.vector_store %arg4[%c0_6, %c0_7], %8 {strides = array<i32>} : memref<8x256xf32, #tpu.memory_space<vmem>>, vector<8x256xf32>,
    return
  }
  func.func @transform_0(%arg0: i32) -> (i32, i32) {
    %c0_i32 = arith.constant 0 : i32
    %c0_i32_0 = arith.constant 0 : i32
    return %arg0, %c0_i32 : i32, i32
  }
  func.func @transform_1(%arg0: i32) -> (i32, i32) {
    %c0_i32 = arith.constant 0 : i32
    %c0_i32_0 = arith.constant 0 : i32
    %c0_i32_1 = arith.constant 0 : i32
    return %c0_i32, %c0_i32_0 : i32, i32
  }
  func.func @transform_2(%arg0: i32) -> (i32, i32) {
    %c0_i32 = arith.constant 0 : i32
    %c0_i32_0 = arith.constant 0 : i32
    %c0_i32_1 = arith.constant 0 : i32
    return %c0_i32, %c0_i32_0 : i32, i32
  }
  func.func @transform_3(%arg0: i32) -> (i32, i32) {
    %c0_i32 = arith.constant 0 : i32
    %c0_i32_0 = arith.constant 0 : i32
    return %arg0, %c0_i32 : i32, i32
  }
}

</mosaic_0001>

<bundles_post_ra>
// kernel: regress.1
= control target key start
LH: loop header
LB: loop body
LE: loop exit
PB: predicated region body
PF: predicated region fallthrough
CT: control target
= control target key end

     0   :  { %8 = vsyncpa [#allocation3], 0  ;;  %s2154_s0 = inlined_call_operand.vmem [shape: f32[16,1024], index: 0, kind: input, shape index: {}]   ;;  %s2155_s1 = inlined_call_operand.vmem [shape: bf16[1024,256], index: 1, kind: input, shape index: {}]   ;;  %s2156_s2 = inlined_call_operand.vmem [shape: f32[1,256], index: 2, kind: input, shape index: {}]   ;;  %s2157_s3 = inlined_call_operand.hbm [shape: f32[16,256], index: 3, kind: output, shape index: {}]  }
   0x1   :  { %10 = vsyncpa [#allocation3 + $0x1], 0  ;;  %s1657_s12 = smov 0   ;;  %s1659_s13 = smov 0  }
   0x2   :  { %s1661_s14 = smov 0   ;;  %s1663_s15 = smov 0  }
   0x3 LB: > { %s1678_s16 = sadd.s32 4294967295, %s1634_s15   ;;  %s935_s17 = sadd.s32 4294967294, %s1634_s15   ;;  %s1634_s15 = sphi %s1663_s15, %s2163_s15   ;;  %s1630_s14 = sphi %s1661_s14, %s2162_s14   ;;  %s1626_s13 = sphi %s1659_s13, %s2161_s13   ;;  %s1622_s12 = sphi %s1657_s12, %s2160_s12  }
   0x4   : > { %s1682_s18 = sadd.s32 1, %s1634_s15   ;;  %s91_s19 = sadd.s32 1, %s1630_s14 }
   0x5   : > { %s88_s20 = ssub.s32 %s1634_s15, %s1682_s18  ;;  %p101_p0 = scmp.ne.s32.totalorder %s1630_s14, %s1626_s13 }
   0x6   : > { %p89_p1 = scmp.eq.s32.totalorder %s88_s20, 0  ;;  %p102_p2 = scmp.eq.s32.totalorder %s1678_s16, 1 }
   0x7   : > { %p107_p3 = scmp.ne.s32.totalorder %s1626_s13, %s1622_s12  ;;  %p108_p4 = scmp.eq.s32.totalorder %s935_s17, 1 }
   0x8   : > { %s1693_s21 = scalar_select %p89_p1, %s1630_s14, %s91_s19  }
   0x9   : > { %p1695_p5 = por %p102_p2, %p101_p0  ;;  %p1699_p6 = por %p108_p4, %p107_p3 }
   0xa   : > { %p938_p7 = scmp.ge.s32.totalorder %s1634_s15, 1  ;;  %p140_p8 = scmp.lt.s32.totalorder %s1634_s15, 3 }
   0xc   : > { %p141_p9 = pnand %p938_p7, %p140_p8 }
   0xd   : > { %v1380_v0 = vld [vmem:[%s2155_s1 + $0x4] ss:$8 sps:$4 sm:$0xff] (!%p141_p9)   ;;  %v1384_v2 = vld [vmem:[%s2155_s1] ss:$8 sps:$4 sm:$0xff] (!%p141_p9)   ;;  %v1386_v4 = vld [vmem:[%s2155_s1 + $0x14] ss:$8 sps:$4 sm:$0xff] (!%p141_p9)  }
   0xe   : > { %144 = sbr.rel (%p141_p9) target bundleno = 375 (0x177), region = 32  ;;  %v1382_v1 = vld [vmem:[%s2155_s1 + $0x204] ss:$8 sps:$4 sm:$0xff] (!%p141_p9)   ;;  %950 = vmatprep.subr.bf16.mxu1 (!%p141_p9), %v1380_v0  ;;  %v1385_v3 = vld [vmem:[%s2155_s1 + $0x200] ss:$8 sps:$4 sm:$0xff] (!%p141_p9)   ;;  %p164_p10 = scmp.lt.s32.totalorder (!%p141_p9), %s1678_s16, 1 }
   0xf   : > { %1078 = vmatprep.subr.bf16.mxu0 (!%p141_p9), %v1382_v1  ;;  %952 = vmatpush1.bf16.msra.mxu1 (!%p141_p9), %v1384_v2  ;;  %v1388_v5 = vld [vmem:[%s2155_s1 + $0x214] ss:$8 sps:$4 sm:$0xff] (!%p141_p9)   ;;  %v1390_v6 = vld [vmem:[%s2155_s1 + $0x10] ss:$8 sps:$4 sm:$0xff] (!%p141_p9)   ;;  %v1392_v8 = vld [vmem:[%s2155_s1 + $0x24] ss:$8 sps:$4 sm:$0xff] (!%p141_p9)  }
  0x10   : > { %1080 = vmatpush1.bf16.msra.mxu0 (!%p141_p9), %v1385_v3  ;;  %954 = vmatprep.subr.bf16.mxu1 (!%p141_p9), %v1386_v4  ;;  %v1391_v7 = vld [vmem:[%s2155_s1 + $0x210] ss:$8 sps:$4 sm:$0xff] (!%p141_p9)   ;;  %v1394_v9 = vld [vmem:[%s2155_s1 + $0x224] ss:$8 sps:$4 sm:$0xff] (!%p141_p9)   ;;  %v1396_v10 = vld [vmem:[%s2155_s1 + $0x20] ss:$8 sps:$4 sm:$0xff] (!%p141_p9)  }
  0x11   : > { %1082 = vmatprep.subr.bf16.mxu0 (!%p141_p9), %v1388_v5  ;;  %v1397_v11 = vld [vmem:[%s2155_s1 + $0x220] ss:$8 sps:$4 sm:$0xff] (!%p141_p9)   ;;  %v1398_v12 = vld [vmem:[%s2155_s1 + $0x34] ss:$8 sps:$4 sm:$0xff] (!%p141_p9)   ;;  %v1402_v14 = vld [vmem:[%s2155_s1 + $0x30] ss:$8 sps:$4 sm:$0xff] (!%p141_p9)  }
  0x12   : > { %v1400_v13 = vld [vmem:[%s2155_s1 + $0x234] ss:$8 sps:$4 sm:$0xff] (!%p141_p9)   ;;  %v1403_v15 = vld [vmem:[%s2155_s1 + $0x230] ss:$8 sps:$4 sm:$0xff] (!%p141_p9)   ;;  %v1404_v16 = vld [vmem:[%s2155_s1 + $0x44] ss:$8 sps:$4 sm:$0xff] (!%p141_p9)  }
  0x13   : > { %956 = vmatpush1.bf16.msra.mxu1 (!%p141_p9), %v1390_v6  ;;  %v1406_v17 = vld [vmem:[%s2155_s1 + $0x244] ss:$8 sps:$4 sm:$0xff] (!%p141_p9)   ;;  %v1408_v18 = vld [vmem:[%s2155_s1 + $0x40] ss:$8 sps:$4 sm:$0xff] (!%p141_p9)   ;;  %v1410_v20 = vld [vmem:[%s2155_s1 + $0x54] ss:$8 sps:$4 sm:$0xff] (!%p141_p9)  }
  0x14   : > { %1084 = vmatpush1.bf16.msra.mxu0 (!%p141_p9), %v1391_v7  ;;  %958 = vmatprep.subr.bf16.mxu1 (!%p141_p9), %v1392_v8  ;;  %v1409_v19 = vld [vmem:[%s2155_s1 + $0x240] ss:$8 sps:$4 sm:$0xff] (!%p141_p9)   ;;  %v1412_v21 = vld [vmem:[%s2155_s1 + $0x254] ss:$8 sps:$4 sm:$0xff] (!%p141_p9)   ;;  %v1414_v22 = vld [vmem:[%s2155_s1 + $0x50] ss:$8 sps:$4 sm:$0xff] (!%p141_p9)  }
  0x15   : > { %1086 = vmatprep.subr.bf16.mxu0 %v1394_v9  ;;  %v1415_v23 = vld [vmem:[%s2155_s1 + $0x250] ss:$8 sps:$4 sm:$0xff]   ;;  %v1416_v24 = vld [vmem:[%s2155_s1 + $0x64] ss:$8 sps:$4 sm:$0xff]   ;;  %v1420_v26 = vld [vmem:[%s2155_s1 + $0x60] ss:$8 sps:$4 sm:$0xff]  }
  0x16   : > { %v1418_v25 = vld [vmem:[%s2155_s1 + $0x264] ss:$8 sps:$4 sm:$0xff]   ;;  %v1421_v27 = vld [vmem:[%s2155_s1 + $0x260] ss:$8 sps:$4 sm:$0xff]   ;;  %v1422_v28 = vld [vmem:[%s2155_s1 + $0x74] ss:$8 sps:$4 sm:$0xff]  }
  0x17   : > { %960 = vmatpush1.bf16.msra.mxu1 %v1396_v10  ;;  %v1424_v29 = vld [vmem:[%s2155_s1 + $0x274] ss:$8 sps:$4 sm:$0xff]   ;;  %v1426_v30 = vld [vmem:[%s2155_s1 + $0x70] ss:$8 sps:$4 sm:$0xff]   ;;  %v1428_v32 = vld [vmem:[%s2155_s1 + $0x84] ss:$8 sps:$4 sm:$0xff]  }
  0x18   : > { %1088 = vmatpush1.bf16.msra.mxu0 %v1397_v11  ;;  %962 = vmatprep.subr.bf16.mxu1 %v1398_v12  ;;  %v1427_v31 = vld [vmem:[%s2155_s1 + $0x270] ss:$8 sps:$4 sm:$0xff]   ;;  %v1430_v33 = vld [vmem:[%s2155_s1 + $0x284] ss:$8 sps:$4 sm:$0xff]   ;;  %v1432_v34 = vld [vmem:[%s2155_s1 + $0x80] ss:$8 sps:$4 sm:$0xff]  }
  0x19   : > { %1090 = vmatprep.subr.bf16.mxu0 %v1400_v13  ;;  %v1433_v35 = vld [vmem:[%s2155_s1 + $0x280] ss:$8 sps:$4 sm:$0xff]   ;;  %v1434_v36 = vld [vmem:[%s2155_s1 + $0x94] ss:$8 sps:$4 sm:$0xff]   ;;  %s165_s26 = scalar_select %p164_p10, %s1678_s16, 1 }
  0x1a   : > { %v1436_v37 = vld [vmem:[%s2155_s1 + $0x294] ss:$8 sps:$4 sm:$0xff]   ;;  %v1438_v38 = vld [vmem:[%s2155_s1 + $0x90] ss:$8 sps:$4 sm:$0xff]   ;;  %v1440_v40 = vld [vmem:[%s2155_s1 + $0xa4] ss:$8 sps:$4 sm:$0xff]  }
  0x1b   : > { %964 = vmatpush1.bf16.msra.mxu1 %v1402_v14  ;;  %v1439_v39 = vld [vmem:[%s2155_s1 + $0x290] ss:$8 sps:$4 sm:$0xff]   ;;  %s947_s8 = sshll.u32 %s165_s26, 6  ;;  %v1442_v41 = vld [vmem:[%s2155_s1 + $0x2a4] ss:$8 sps:$4 sm:$0xff]   ;;  %s161_s26 = sand.u32 1, %s1626_s13  }
  0x1c   : > { %1092 = vmatpush1.bf16.msra.mxu0 %v1403_v15  ;;  %966 = vmatprep.subr.bf16.mxu1 %v1404_v16  ;;  %v1444_v42 = vld [vmem:[%s2155_s1 + $0xa0] ss:$8 sps:$4 sm:$0xff]   ;;  %s1842_s27 = scalar_lea.vmem %s2154_s0, %s947_s8  ;;  %v1446_v44 = vld [vmem:[%s2155_s1 + $0xb4] ss:$8 sps:$4 sm:$0xff]   ;;  %v1450_v47 = vld [vmem:[%s2155_s1 + $0xb0] ss:$8 sps:$4 sm:$0xff]  }
  0x1d   : > { %1094 = vmatprep.subr.bf16.mxu0 %v1406_v17  ;;  %v1445_v43 = vld [vmem:[%s2155_s1 + $0x2a0] ss:$8 sps:$4 sm:$0xff]   ;;  %v1448_v45 = vld [vmem:[%s2155_s1 + $0x2b4] ss:$8 sps:$4 sm:$0xff]   ;;  %v1451_v48 = vld [vmem:[%s2155_s1 + $0x2b0] ss:$8 sps:$4 sm:$0xff]  }
  0x1e   : > { %v170_v46 = vld [vmem:[%s1842_s27 + $0x8] sm:$0xff]  ;;  %v1458_v54 = vld [vmem:[%s2155_s1 + $0xd4] ss:$8 sps:$4 sm:$0xff]   ;;  %v1462_v56 = vld [vmem:[%s2155_s1 + $0xd0] ss:$8 sps:$4 sm:$0xff]   ;;  %s939_s28 = sshll.u32 %s161_s26, 4 }
  0x1f   : > { %968 = vmatpush1.bf16.msra.mxu1 %v1408_v18  ;;  %637 = vmatprep.mubr.f32.mxu1 %v170_v46  ;;  %v174_v49 = vld [vmem:[%s1842_s27 + $0x28] sm:$0xff]  ;;  %v1460_v55 = vld [vmem:[%s2155_s1 + $0x2d4] ss:$8 sps:$4 sm:$0xff]   ;;  %v1463_v57 = vld [vmem:[%s2155_s1 + $0x2d0] ss:$8 sps:$4 sm:$0xff]   ;;  %s163_s29 = scalar_lea.vmem [#allocation2], %s939_s28 }
  0x20   : > { %1096 = vmatpush1.bf16.msra.mxu0 %v1409_v19  ;;  %970 = vmatprep.subr.bf16.mxu1 %v1410_v20  ;;  %v1452_v50 = vld [vmem:[%s2155_s1 + $0xc4] ss:$8 sps:$4 sm:$0xff]   ;;  %v1456_v52 = vld [vmem:[%s2155_s1 + $0xc0] ss:$8 sps:$4 sm:$0xff]   ;;  %v1470_v62 = vld [vmem:[%s2155_s1 + $0xf4] ss:$8 sps:$4 sm:$0xff]  }
  0x21   : > { %1098 = vmatprep.subr.bf16.mxu0 %v1412_v21  ;;  %v1454_v51 = vld [vmem:[%s2155_s1 + $0x2c4] ss:$8 sps:$4 sm:$0xff]   ;;  %779 = vmatprep.mubr.f32.mxu0 %v174_v49  ;;  %v1457_v53 = vld [vmem:[%s2155_s1 + $0x2c0] ss:$8 sps:$4 sm:$0xff]   ;;  %v1472_v63 = vld [vmem:[%s2155_s1 + $0x2f4] ss:$8 sps:$4 sm:$0xff]  }
  0x22   : > { %v1464_v58 = vld [vmem:[%s2155_s1 + $0xe4] ss:$8 sps:$4 sm:$0xff]   ;;  %v1468_v60 = vld [vmem:[%s2155_s1 + $0xe0] ss:$8 sps:$4 sm:$0xff]   ;;  %v1474_v0 = vld [vmem:[%s2155_s1 + $0xf0] ss:$8 sps:$4 sm:$0xff]  }
  0x23   : > { %972 = vmatpush1.bf16.msra.mxu1 %v1414_v22  ;;  %v1466_v59 = vld [vmem:[%s2155_s1 + $0x2e4] ss:$8 sps:$4 sm:$0xff]   ;;  %v1469_v61 = vld [vmem:[%s2155_s1 + $0x2e0] ss:$8 sps:$4 sm:$0xff]   ;;  %v1475_v1 = vld [vmem:[%s2155_s1 + $0x2f0] ss:$8 sps:$4 sm:$0xff]  }
  0x24   : > { %1100 = vmatpush1.bf16.msra.mxu0 %v1415_v23  ;;  %974 = vmatprep.subr.bf16.mxu1 %v1416_v24  ;;  %v1476_v2 = vld [vmem:[%s2155_s1 + $0x104] ss:$8 sps:$4 sm:$0xff]   ;;  %v1478_v4 = vld [vmem:[%s2155_s1 + $0x100] ss:$8 sps:$4 sm:$0xff]   ;;  %v1482_v8 = vld [vmem:[%s2155_s1 + $0x114] ss:$8 sps:$4 sm:$0xff]  }
  0x25   : > { %1102 = vmatprep.subr.bf16.mxu0 %v1418_v25  ;;  %v1479_v3 = vld [vmem:[%s2155_s1 + $0x304] ss:$8 sps:$4 sm:$0xff]   ;;  %v1481_v5 = vld [vmem:[%s2155_s1 + $0x300] ss:$8 sps:$4 sm:$0xff]   ;;  %v1485_v9 = vld [vmem:[%s2155_s1 + $0x314] ss:$8 sps:$4 sm:$0xff]  }
  0x26   : > { %v169_v6 = vld [vmem:[%s1842_s27] sm:$0xff]  ;;  %v1484_v10 = vld [vmem:[%s2155_s1 + $0x110] ss:$8 sps:$4 sm:$0xff]   ;;  %v1494_v16 = vld [vmem:[%s2155_s1 + $0x134] ss:$8 sps:$4 sm:$0xff]   ;;  %s876_s30 = sshll.u32 %s163_s29, 4  ;;  %s2114_s30 = int_to_ptr.vmem [resolvable:$true] %s876_s30 }
  0x27   : > { %976 = vmatpush1.bf16.msra.mxu1 %v1420_v26  ;;  %v173_v7 = vld [vmem:[%s1842_s27 + $0x20] sm:$0xff]  ;;  %v1487_v11 = vld [vmem:[%s2155_s1 + $0x310] ss:$8 sps:$4 sm:$0xff]   ;;  %v1497_v17 = vld [vmem:[%s2155_s1 + $0x334] ss:$8 sps:$4 sm:$0xff]   ;;  %s862_s7 = scalar_lea.sflag [#allocation3], %s161_s26 }
  0x28   : > { %1104 = vmatpush1.bf16.msra.mxu0 %v1421_v27  ;;  %978 = vmatprep.subr.bf16.mxu1 %v1422_v28  ;;  %v1488_v12 = vld [vmem:[%s2155_s1 + $0x124] ss:$8 sps:$4 sm:$0xff]   ;;  %v1490_v14 = vld [vmem:[%s2155_s1 + $0x120] ss:$8 sps:$4 sm:$0xff]   ;;  %v1496_v18 = vld [vmem:[%s2155_s1 + $0x130] ss:$8 sps:$4 sm:$0xff]  }
  0x29   : > { %1106 = vmatprep.subr.bf16.mxu0 %v1424_v29  ;;  %v1491_v13 = vld [vmem:[%s2155_s1 + $0x324] ss:$8 sps:$4 sm:$0xff]   ;;  %v1493_v15 = vld [vmem:[%s2155_s1 + $0x320] ss:$8 sps:$4 sm:$0xff]   ;;  %v1499_v19 = vld [vmem:[%s2155_s1 + $0x330] ss:$8 sps:$4 sm:$0xff]  }
  0x2a   : > { %v1500_v20 = vld [vmem:[%s2155_s1 + $0x144] ss:$8 sps:$4 sm:$0xff]   ;;  %v1502_v22 = vld [vmem:[%s2155_s1 + $0x140] ss:$8 sps:$4 sm:$0xff]   ;;  %v1506_v24 = vld [vmem:[%s2155_s1 + $0x154] ss:$8 sps:$4 sm:$0xff]  }
  0x2b   : > { %980 = vmatpush1.bf16.msra.mxu1 %v1426_v30  ;;  %v1503_v21 = vld [vmem:[%s2155_s1 + $0x344] ss:$8 sps:$4 sm:$0xff]   ;;  %v1505_v23 = vld [vmem:[%s2155_s1 + $0x340] ss:$8 sps:$4 sm:$0xff]   ;;  %v1509_v25 = vld [vmem:[%s2155_s1 + $0x354] ss:$8 sps:$4 sm:$0xff]  }
  0x2c   : > { %1108 = vmatpush1.bf16.msra.mxu0 %v1427_v31  ;;  %982 = vmatprep.subr.bf16.mxu1 %v1428_v32  ;;  %v1508_v26 = vld [vmem:[%s2155_s1 + $0x150] ss:$8 sps:$4 sm:$0xff]   ;;  %v1512_v28 = vld [vmem:[%s2155_s1 + $0x164] ss:$8 sps:$4 sm:$0xff]   ;;  %v1514_v32 = vld [vmem:[%s2155_s1 + $0x160] ss:$8 sps:$4 sm:$0xff]  }
  0x2d   : > { %1110 = vmatprep.subr.bf16.mxu0 %v1430_v33  ;;  %v1511_v27 = vld [vmem:[%s2155_s1 + $0x350] ss:$8 sps:$4 sm:$0xff]   ;;  %v1515_v29 = vld [vmem:[%s2155_s1 + $0x364] ss:$8 sps:$4 sm:$0xff]   ;;  %v1517_v33 = vld [vmem:[%s2155_s1 + $0x360] ss:$8 sps:$4 sm:$0xff]  }
  0x2e   : > { %v172_v30 = vld [vmem:[%s1842_s27 + $0x18] sm:$0xff]  ;;  %v1536_v46 = vld [vmem:[%s2155_s1 + $0x1a4] ss:$8 sps:$4 sm:$0xff]   ;;  %v1541_v49 = vld [vmem:[%s2155_s1 + $0x3a0] ss:$8 sps:$4 sm:$0xff]   ;;  %s1572_s8 = scalar_lea.vmem %s2114_s30, 256 }
  0x2f   : > { %984 = vmatpush1.bf16.msra.mxu1 %v1432_v34  ;;  %v176_v31 = vld [vmem:[%s1842_s27 + $0x38] sm:$0xff]  ;;  %p1573_p11 = scmp.ne.s32.totalorder %s2114_s30, %s1572_s8 }
  0x30   : > { %1112 = vmatpush1.bf16.msra.mxu0 %v1433_v35  ;;  %986 = vmatprep.subr.bf16.mxu1 %v1434_v36  ;;  %v1518_v34 = vld [vmem:[%s2155_s1 + $0x174] ss:$8 sps:$4 sm:$0xff]   ;;  %v1520_v36 = vld [vmem:[%s2155_s1 + $0x170] ss:$8 sps:$4 sm:$0xff]  }
  0x31   : > { %1114 = vmatprep.subr.bf16.mxu0 %v1436_v37  ;;  %v1521_v35 = vld [vmem:[%s2155_s1 + $0x374] ss:$8 sps:$4 sm:$0xff]   ;;  %v1523_v37 = vld [vmem:[%s2155_s1 + $0x370] ss:$8 sps:$4 sm:$0xff]   ;;  %p1574_p12 = pnand %p1573_p11, %p1695_p5 }
  0x33   : > { %988 = vmatpush1.bf16.msra.mxu1 %v1438_v38  ;;  %v1524_v38 = vld [vmem:[%s2155_s1 + $0x184] ss:$8 sps:$4 sm:$0xff]   ;;  %p1575_p13 = pneg %p1574_p12 }
  0x34   : > { %1116 = vmatpush1.bf16.msra.mxu0 %v1439_v39  ;;  %990 = vmatprep.subr.bf16.mxu1 %v1440_v40  ;;  %v1527_v39 = vld [vmem:[%s2155_s1 + $0x384] ss:$8 sps:$4 sm:$0xff]   ;;  %v1526_v40 = vld [vmem:[%s2155_s1 + $0x180] ss:$8 sps:$4 sm:$0xff]  }
  0x35   : > { %1118 = vmatprep.subr.bf16.mxu0 %v1442_v41  ;;  %v1529_v41 = vld [vmem:[%s2155_s1 + $0x380] ss:$8 sps:$4 sm:$0xff]  }
  0x37   : > { %992 = vmatpush1.bf16.msra.mxu1 %v1444_v42  ;;  %v1530_v42 = vld [vmem:[%s2155_s1 + $0x194] ss:$8 sps:$4 sm:$0xff]  }
  0x38   : > { %1120 = vmatpush1.bf16.msra.mxu0 %v1445_v43  ;;  %994 = vmatprep.subr.bf16.mxu1 %v1446_v44  ;;  %v1533_v43 = vld [vmem:[%s2155_s1 + $0x394] ss:$8 sps:$4 sm:$0xff]   ;;  %v1532_v44 = vld [vmem:[%s2155_s1 + $0x190] ss:$8 sps:$4 sm:$0xff]  }
  0x39   : > { %1122 = vmatprep.subr.bf16.mxu0 %v1448_v45  ;;  %v1535_v45 = vld [vmem:[%s2155_s1 + $0x390] ss:$8 sps:$4 sm:$0xff]  }
  0x3b   : > { %996 = vmatpush1.bf16.msra.mxu1 %v1450_v47  ;;  %v1539_v47 = vld [vmem:[%s2155_s1 + $0x3a4] ss:$8 sps:$4 sm:$0xff]  }
  0x3c   : > { %1124 = vmatpush1.bf16.msra.mxu0 %v1451_v48  ;;  %998 = vmatprep.subr.bf16.mxu1 %v1452_v50  ;;  %v1538_v48 = vld [vmem:[%s2155_s1 + $0x1a0] ss:$8 sps:$4 sm:$0xff]   ;;  %v1542_v50 = vld [vmem:[%s2155_s1 + $0x1b4] ss:$8 sps:$4 sm:$0xff]  }
  0x3d   : > { %1126 = vmatprep.subr.bf16.mxu0 %v1454_v51  ;;  %v1545_v51 = vld [vmem:[%s2155_s1 + $0x3b4] ss:$8 sps:$4 sm:$0xff]  }
  0x3f   : > { %1000 = vmatpush1.bf16.msra.mxu1 %v1456_v52  ;;  %v1544_v52 = vld [vmem:[%s2155_s1 + $0x1b0] ss:$8 sps:$4 sm:$0xff]  }
  0x40   : > { %1128 = vmatpush1.bf16.msra.mxu0 %v1457_v53  ;;  %1002 = vmatprep.subr.bf16.mxu1 %v1458_v54  ;;  %v1547_v53 = vld [vmem:[%s2155_s1 + $0x3b0] ss:$8 sps:$4 sm:$0xff]   ;;  %v1548_v54 = vld [vmem:[%s2155_s1 + $0x1c4] ss:$8 sps:$4 sm:$0xff]  }
  0x41   : > { %1130 = vmatprep.subr.bf16.mxu0 %v1460_v55  ;;  %v1551_v55 = vld [vmem:[%s2155_s1 + $0x3c4] ss:$8 sps:$4 sm:$0xff]  }
  0x43   : > { %1004 = vmatpush1.bf16.msra.mxu1 %v1462_v56  ;;  %v1550_v56 = vld [vmem:[%s2155_s1 + $0x1c0] ss:$8 sps:$4 sm:$0xff]  }
  0x44   : > { %1132 = vmatpush1.bf16.msra.mxu0 %v1463_v57  ;;  %1006 = vmatprep.subr.bf16.mxu1 %v1464_v58  ;;  %v1553_v57 = vld [vmem:[%s2155_s1 + $0x3c0] ss:$8 sps:$4 sm:$0xff]   ;;  %v1554_v58 = vld [vmem:[%s2155_s1 + $0x1d4] ss:$8 sps:$4 sm:$0xff]  }
  0x45   : > { %1134 = vmatprep.subr.bf16.mxu0 %v1466_v59  ;;  %v1557_v59 = vld [vmem:[%s2155_s1 + $0x3d4] ss:$8 sps:$4 sm:$0xff]  }
  0x47   : > { %1008 = vmatpush1.bf16.msra.mxu1 %v1468_v60  ;;  %v1556_v60 = vld [vmem:[%s2155_s1 + $0x1d0] ss:$8 sps:$4 sm:$0xff]  }
  0x48   : > { %1136 = vmatpush1.bf16.msra.mxu0 %v1469_v61  ;;  %1010 = vmatprep.subr.bf16.mxu1 %v1470_v62  ;;  %v1559_v61 = vld [vmem:[%s2155_s1 + $0x3d0] ss:$8 sps:$4 sm:$0xff]   ;;  %v1560_v62 = vld [vmem:[%s2155_s1 + $0x1e4] ss:$8 sps:$4 sm:$0xff]  }
  0x49   : > { %1138 = vmatprep.subr.bf16.mxu0 %v1472_v63  ;;  %v1563_v63 = vld [vmem:[%s2155_s1 + $0x3e4] ss:$8 sps:$4 sm:$0xff]  }
  0x4b   : > { %1012 = vmatpush1.bf16.msra.mxu1 %v1474_v0  ;;  %v1562_v0 = vld [vmem:[%s2155_s1 + $0x1e0] ss:$8 sps:$4 sm:$0xff]  }
  0x4c   : > { %1140 = vmatpush1.bf16.msra.mxu0 %v1475_v1  ;;  %1014 = vmatprep.subr.bf16.mxu1 %v1476_v2  ;;  %v1565_v1 = vld [vmem:[%s2155_s1 + $0x3e0] ss:$8 sps:$4 sm:$0xff]   ;;  %v1566_v2 = vld [vmem:[%s2155_s1 + $0x1f4] ss:$8 sps:$4 sm:$0xff]  }
  0x4d   : > { %1142 = vmatprep.subr.bf16.mxu0 %v1479_v3  ;;  %v1569_v3 = vld [vmem:[%s2155_s1 + $0x3f4] ss:$8 sps:$4 sm:$0xff]  }
  0x4e   : > { %638 = vmatmul.mubr.f32.vlgmr.msra.gmra.mrb[0].mxu1 %v169_v6  ;;  %v171_v6 = vld [vmem:[%s1842_s27 + $0x10] sm:$0xff] }
  0x4f   : > { %780 = vmatmul.mubr.f32.vlgmr.msra.gmra.mrb[0].mxu0 %v173_v7  ;;  %1016 = vmatpush1.bf16.msra.mxu1 %v1478_v4  ;;  %v1568_v4 = vld [vmem:[%s2155_s1 + $0x1f0] ss:$8 sps:$4 sm:$0xff]  }
  0x50   : > { %1144 = vmatpush1.bf16.msra.mxu0 %v1481_v5  ;;  %1018 = vmatprep.subr.bf16.mxu1 %v1482_v8  ;;  %v1571_v5 = vld [vmem:[%s2155_s1 + $0x3f0] ss:$8 sps:$4 sm:$0xff]   ;;  %v563_v8 = vlaneseq }
  0x51   : > { %1146 = vmatprep.subr.bf16.mxu0 %v1485_v9  ;;  %708 = vmatprep.mubr.f32.mxu1 %v172_v30  ;;  %v175_v7 = vld [vmem:[%s1842_s27 + $0x30] sm:$0xff]  ;;  %s948_s27 = sshll.u32 %s1678_s16, 8  ;;  %s1636_s16 = smov [#allocation2]  }
  0x52   : > { %850 = vmatprep.mubr.f32.mxu0 %v176_v31  ;;  %v564_v9 = vshrl.u32 %v563_v8, 7  ;;  %s2112_s6 = scalar_lea.hbm %s2157_s3, %s948_s27  ;;  %s1576_s9 = sshll.u32 %s1636_s16, 4  ;;  %s1577_s9 = int_to_ptr.vmem [resolvable:$false] %s1576_s9 }
  0x53   : > { %1020 = vmatpush1.bf16.msra.mxu1 %v1484_v10  ;;  %s1578_s10 = scalar_lea.vmem %s1577_s9, 512  ;;  %p1579_p0 = scmp.lt.s32.totalorder %s2114_s30, %s1577_s9 }
  0x54   : > { %1148 = vmatpush1.bf16.msra.mxu0 %v1487_v11  ;;  %1022 = vmatprep.subr.bf16.mxu1 %v1488_v12  ;;  %v565_v10 = vsub.s32 0, %v564_v9  ;;  %v561_v11 = vld [vmem:[%s2156_s2] sm:$0x3]  ;;  %v569_v12 = vsub.s32 1, %v564_v9  ;;  %p1580_p1 = scmp.lt.s32.totalorder %s1578_s10, %s1572_s8 }
  0x55   : > { %1150 = vmatprep.subr.bf16.mxu0 %v1491_v13 }
  0x56   : > { %v566_v13 = vrot.slane %v561_v11, %v565_v10  ;;  %p1581_p2 = por %p1580_p1, %p1579_p0 }
  0x57   : > { %1024 = vmatpush1.bf16.msra.mxu1 %v1490_v14  ;;  %v570_v14 = vrot.slane %v561_v11, %v569_v12 }
  0x58   : > { %1152 = vmatpush1.bf16.msra.mxu0 %v1493_v15  ;;  %1026 = vmatprep.subr.bf16.mxu1 %v1494_v16  ;;  %p1582_p3 = pnand %p1581_p2, %p1575_p13 }
  0x59   : > { %1154 = vmatprep.subr.bf16.mxu0 %v1497_v17 }
  0x5b   : > { %1028 = vmatpush1.bf16.msra.mxu1 %v1496_v18 }
  0x5c   : > { %1156 = vmatpush1.bf16.msra.mxu0 %v1499_v19  ;;  %1030 = vmatprep.subr.bf16.mxu1 %v1500_v20 }
  0x5d   : > { %1158 = vmatprep.subr.bf16.mxu0 %v1503_v21 }
  0x5f   : > { %1032 = vmatpush1.bf16.msra.mxu1 %v1502_v22 }
  0x60   : > { %1160 = vmatpush1.bf16.msra.mxu0 %v1505_v23  ;;  %1034 = vmatprep.subr.bf16.mxu1 %v1506_v24 }
  0x61   : > { %1162 = vmatprep.subr.bf16.mxu0 %v1509_v25 }
  0x63   : > { %1036 = vmatpush1.bf16.msra.mxu1 %v1508_v26 }
  0x64   : > { %1164 = vmatpush1.bf16.msra.mxu0 %v1511_v27  ;;  %1038 = vmatprep.subr.bf16.mxu1 %v1512_v28 }
  0x65   : > { %1166 = vmatprep.subr.bf16.mxu0 %v1515_v29 }
  0x67   : > { %1040 = vmatpush1.bf16.msra.mxu1 %v1514_v32 }
  0x68   : > { %1168 = vmatpush1.bf16.msra.mxu0 %v1517_v33  ;;  %1042 = vmatprep.subr.bf16.mxu1 %v1518_v34 }
  0x69   : > { %1170 = vmatprep.subr.bf16.mxu0 %v1521_v35 }
  0x6b   : > { %1044 = vmatpush1.bf16.msra.mxu1 %v1520_v36 }
  0x6c   : > { %1172 = vmatpush1.bf16.msra.mxu0 %v1523_v37  ;;  %1046 = vmatprep.subr.bf16.mxu1 %v1524_v38 }
  0x6d   : > { %1174 = vmatprep.subr.bf16.mxu0 %v1527_v39 }
  0x6f   : > { %1048 = vmatpush1.bf16.msra.mxu1 %v1526_v40 }
  0x70   : > { %1176 = vmatpush1.bf16.msra.mxu0 %v1529_v41  ;;  %1050 = vmatprep.subr.bf16.mxu1 %v1530_v42 }
  0x71   : > { %1178 = vmatprep.subr.bf16.mxu0 %v1533_v43 }
  0x73   : > { %1052 = vmatpush1.bf16.msra.mxu1 %v1532_v44 }
  0x74   : > { %1180 = vmatpush1.bf16.msra.mxu0 %v1535_v45  ;;  %1054 = vmatprep.subr.bf16.mxu1 %v1536_v46 }
  0x75   : > { %1182 = vmatprep.subr.bf16.mxu0 %v1539_v47 }
  0x77   : > { %1056 = vmatpush1.bf16.msra.mxu1 %v1538_v48 }
  0x78   : > { %1184 = vmatpush1.bf16.msra.mxu0 %v1541_v49  ;;  %1058 = vmatprep.subr.bf16.mxu1 %v1542_v50 }
  0x79   : > { %1186 = vmatprep.subr.bf16.mxu0 %v1545_v51 }
  0x7b   : > { %1060 = vmatpush1.bf16.msra.mxu1 %v1544_v52 }
  0x7c   : > { %1188 = vmatpush1.bf16.msra.mxu0 %v1547_v53  ;;  %1062 = vmatprep.subr.bf16.mxu1 %v1548_v54 }
  0x7d   : > { %1190 = vmatprep.subr.bf16.mxu0 %v1551_v55 }
  0x7f   : > { %1064 = vmatpush1.bf16.msra.mxu1 %v1550_v56 }
  0x80   : > { %1192 = vmatpush1.bf16.msra.mxu0 %v1553_v57  ;;  %1066 = vmatprep.subr.bf16.mxu1 %v1554_v58 }
  0x81   : > { %1194 = vmatprep.subr.bf16.mxu0 %v1557_v59 }
  0x83   : > { %1068 = vmatpush1.bf16.msra.mxu1 %v1556_v60 }
  0x84   : > { %1196 = vmatpush1.bf16.msra.mxu0 %v1559_v61  ;;  %1070 = vmatprep.subr.bf16.mxu1 %v1560_v62 }
  0x85   : > { %1198 = vmatprep.subr.bf16.mxu0 %v1563_v63 }
  0x87   : > { %1072 = vmatpush1.bf16.msra.mxu1 %v1562_v0 }
  0x88   : > { %1200 = vmatpush1.bf16.msra.mxu0 %v1565_v1  ;;  %1074 = vmatprep.subr.bf16.mxu1 %v1566_v2 }
  0x89   : > { %1202 = vmatprep.subr.bf16.mxu0 %v1569_v3 }
  0x8b   : > { %1076 = vmatpush1.bf16.msra.mxu1 %v1568_v4 }
  0x8c   : > { %1204 = vmatpush1.bf16.msra.mxu0 %v1571_v5 }
  0x8e   : > { %709 = vmatmul.mubr.f32.vlgmr.msra.gmra.mrb[0].mxu1 %v171_v6 }
  0x8f   : > { %851 = vmatmul.mubr.f32.vlgmr.msra.gmra.mrb[0].mxu0 %v175_v7 }
 0x161   : > { %v710_v15 = vpop.f32.mrb[0].mxu1 }
 0x162   : > { %v852_v16 = vpop.f32.mrb[0].mxu0  ;;  %v1205_v17 = vadd.f32 %v710_v15, %v566_v13  ;;  %v712_v18 = vpop.f32.mrb[1].mxu1 }
 0x163   : > { %v854_v19 = vpop.f32.mrb[1].mxu0  ;;  %v1207_v20 = vadd.f32 %v712_v18, %v570_v14 }
 0x164   : > { %v1206_v21 = vadd.f32 %v1205_v17, %v852_v16 }
 0x165   : > { %v1208_v22 = vadd.f32 %v1207_v20, %v854_v19 }
 0x166   : > { %v857_v23 = vmax.f32 %v1206_v21, 0.0 }
 0x167   : > { %v858_v24 = vmax.f32 %v1208_v22, 0.0 }
 0x168   : > { %859 = vst [vmem:[%s163_s29] sm:$0xff] %v857_v23 }
 0x169   : > { %860 = vst [vmem:[%s163_s29 + $0x8] sm:$0xff] %v858_v24 }
 0x16a   : > { %1585 = shalt.err (!%p1582_p3)
}
 0x16b   : > { %s1586_s11 = scalar_lea.hbm %s2112_s6, 256  ;;  %s1590_s20 = scalar_lea.hbm %s2157_s3, 512 }
 0x16c   : > { %p1587_p4 = scmp.ne.s32.totalorder %s2112_s6, %s1586_s11  ;;  %p1591_p9 = scmp.lt.u32.totalorder %s2112_s6, %s2157_s3 }
 0x16d   : > { %p1592_p10 = scmp.lt.u32.totalorder %s1590_s20, %s1586_s11  ;;  %p1594_p12 = scmp.lt.u32.totalorder %s1586_s11, %s2112_s6 }
 0x16e   : > { %p1588_p7 = pnand %p1587_p4, %p1695_p5 }
 0x16f   : > { %p1593_p11 = por %p1592_p10, %p1591_p9 }
 0x170   : > { %p1589_p8 = pneg %p1588_p7 }
 0x171   : > { %p1595_p13 = por %p1594_p12, %p1593_p11 }
 0x173   : > { %p1596_p0 = pnand %p1595_p13, %p1589_p8 }
 0x175   : > { %1599 = shalt.err (!%p1596_p0)
}
 0x176   : > { %1341 = dma.vmem_to_hbm [thread:$0]  (%p1695_p5), %s2114_s30, 256, %s2112_s6, %s862_s7  }
 0x177 PF: > { %p1347_p1 = scmp.ge.s32.totalorder %s1634_s15, 2  ;;  %s888_s26 = sand.u32 1, %s1622_s12  }
 0x178   : > { %s889_s28 = scalar_lea.sflag [#allocation3], %s888_s26 }
 0x179   : > { %p1344_p2 = pnand %p1347_p1, %p1699_p6 }
 0x17b   : > { %1617 = dma.done.wait (!%p1344_p2), %s889_s28, 256  }
 0x17c   : > { %1619 = vsyncadd (!%p1344_p2), %s889_s28, 4294967040  ;;  %p13_p3 = scmp.ge.s32.totalorder %s1682_s18, 4   ;;  %s2160_s12 = smov %s1626_s13 }
 0x17d   : > { %s2161_s13 = smov %s1630_s14  ;;  %s2162_s14 = smov %s1693_s21 }
 0x17e   : > { %s2163_s15 = smov %s1682_s18  ;;  %15 = sbr.rel (!%p13_p3) target bundleno = 3 (0x3), region = 67 }
 0x185   :  { %894 = vsyncpa [#allocation3], 1 }
 0x186   :  { %896 = vsyncpa [#allocation3 + $0x1], 1 }

</bundles_post_ra>
